<compile_context>
chip_gen: v7x
topology: tpu7x:2x2x1
jax: 0.10.0
libtpu: 0.0.40
codegen_flags: <defaults>
</compile_context>

<pallas_src>
import functools

import jax
import jax.numpy as jnp
from jax.experimental import pallas as pl
from jax.experimental.pallas import tpu as pltpu


LANE = 128       # last-dim (lane) padding multiple
SUBLANE = 8      # second-to-last (sublane) multiple


def _round_up(v, m):
    return ((v + m - 1) // m) * m


def _tpu_generation_params():
    """Generation-aware (physical VMEM bytes per core, #TensorCores per chip)."""
    vmem_bytes = None
    try:
        info = pltpu.get_tpu_info()
        vmem_bytes = getattr(info, "vmem_capacity_bytes", None)
    except Exception:
        vmem_bytes = None
    try:
        kind = jax.devices()[0].device_kind.lower()
    except Exception:
        kind = ""
    is_v7 = "v7" in kind
    if vmem_bytes is None:
        vmem_bytes = (64 if is_v7 else 128) * 1024 * 1024
    num_cores = 2 if is_v7 else 1
    return int(vmem_bytes), num_cores


# ----------------------------- Pallas kernel ---------------------------------
def _fused_mlp_kernel(*refs, num_layers):
    """Entire MLP for one batch tile.

    refs = (x_ref, w0, b0, w1, b1, ..., out_ref, h_scratch)

    Matmuls run on the MXU with bf16 operands and f32 accumulation; bias add
    and ReLU stay in f32 (safe on v5e which has no bf16 VPU).  Hidden
    activations are stored bf16 in the VMEM scratch buffer (no HBM traffic
    between layers, half the scratch bytes).
    """
    x_ref = refs[0]
    out_ref = refs[1 + 2 * num_layers]
    h_scratch = refs[2 + 2 * num_layers]

    h = x_ref[...]                                   # bf16 activations
    for layer in range(num_layers):
        w_ref = refs[1 + 2 * layer]
        b_ref = refs[2 + 2 * layer]
        acc = jnp.dot(h, w_ref[...], preferred_element_type=jnp.float32)
        acc = acc + b_ref[...]                       # f32 bias add (broadcasts)
        if layer != num_layers - 1:
            # ReLU in f32, single cast on the store into bf16 VMEM scratch.
            h_scratch[...] = jnp.maximum(acc, 0.0).astype(h_scratch.dtype)
            h = h_scratch[...]
        else:
            out_ref[...] = acc.astype(out_ref.dtype)


# ----------------------- One-time parameter preparation ----------------------
def prepare_mlp_params(params, compute_dtype=jnp.bfloat16):
    """One-time prep: zero-pad feature dims to LANE multiples and pre-cast
    weights to the MXU compute dtype.  Do this ONCE, not per forward call."""
    in_dims = [w.shape[0] for w, _ in params]
    out_dims = [w.shape[1] for w, _ in params]
    in_pads = [_round_up(d, LANE) for d in in_dims]
    out_pads = [_round_up(d, LANE) for d in out_dims]

    flat_wb = []
    for (w, b), dip, dop in zip(params, in_pads, out_pads):
        w_p = jnp.zeros((dip, dop), compute_dtype).at[:w.shape[0], :w.shape[1]].set(
            w.astype(compute_dtype))
        b_p = jnp.zeros((1, dop), jnp.float32).at[0, :b.shape[0]].set(
            b.astype(jnp.float32))
        flat_wb += [w_p, b_p]

    return dict(
        flat_wb=flat_wb,
        in_dims=in_dims, out_dims=out_dims,
        in_pads=in_pads, out_pads=out_pads,
        compute_dtype=compute_dtype,
        num_layers=len(params),
    )
    # TODO(synk): optional int8 (v5e/v6e) / fp8 (v7x) weight path for
    # weight-DMA-bound small-batch inference.


# ------------------------------ Forward wrapper --------------------------------
def mlp_forward_fused(prepped, x, *, out_dtype=jnp.float32):
    """prepped: output of prepare_mlp_params; x: [B, Din] f32."""
    B, Din = x.shape
    num_layers = prepped["num_layers"]
    in_pads, out_pads = prepped["in_pads"], prepped["out_pads"]
    din_pad, dout_pad = in_pads[0], out_pads[-1]
    out_dim = prepped["out_dims"][-1]
    compute_dtype = prepped["compute_dtype"]
    assert Din == prepped["in_dims"][0]

    # All hidden layers of this MLP share one width (true for the PyTorch mlp()).
    assert len(set(out_pads[:-1])) <= 1, "hidden widths must match"
    h_scratch_w = out_pads[0] if num_layers > 1 else LANE

    # Generation-aware knobs.
    vmem_phys, num_cores = _tpu_generation_params()
    vmem_limit = (vmem_phys * 3) // 4            # ~96 MiB v5e/v6e, ~48 MiB v7x
    max_batch_tile = 512 if vmem_phys >= 128 * 1024 * 1024 else 256

    # Batch tiling; on multi-TC chips (v7x) force >= num_cores grid steps so
    # both TensorCores get work under dimension_semantics=("parallel",).
    b8 = _round_up(B, SUBLANE)
    tm = min(b8, max_batch_tile)
    if num_cores > 1 and b8 >= num_cores * SUBLANE:
        tm = min(tm, _round_up(pl.cdiv(b8, num_cores), SUBLANE))
    b_pad = _round_up(b8, tm)
    grid = (b_pad // tm,)

    # Pad + pre-cast activations to bf16 (halves x DMA and its VMEM tile).
    x_p = jnp.zeros((b_pad, din_pad), compute_dtype).at[:B, :Din].set(
        x.astype(compute_dtype))

    wt_bytes = jnp.dtype(compute_dtype).itemsize
    out_bytes = jnp.dtype(out_dtype).itemsize

    # BlockSpecs: x/out tiled over batch (double-buffered by the pipeline);
    # every weight/bias is a single constant block (same index every step) ->
    # single-buffered so it only occupies VMEM once.
    in_specs = [pl.BlockSpec((tm, din_pad), lambda i: (i, 0))]
    for dip, dop in zip(in_pads, out_pads):
        in_specs.append(pl.BlockSpec((dip, dop), lambda i: (0, 0),
                                     pipeline_mode=pl.Buffered(1)))
        in_specs.append(pl.BlockSpec((1, dop), lambda i: (0, 0),
                                     pipeline_mode=pl.Buffered(1)))
    out_specs = pl.BlockSpec((tm, dout_pad), lambda i: (i, 0))

    # VMEM budget check (streamed tiles + single-buffered weights + scratch
    # + the f32 acc temporaries the compiler materializes in the epilogue).
    max_out_pad = max(out_pads)
    vmem_need = (
        2 * tm * din_pad * wt_bytes                    # x tile (double-buffered)
        + 2 * tm * dout_pad * out_bytes                # out tile (double-buffered)
        + sum(dip * dop * wt_bytes + dop * 4           # weights/biases (single-buffered)
              for dip, dop in zip(in_pads, out_pads))
        + tm * h_scratch_w * wt_bytes                  # bf16 hidden scratch
        + 2 * tm * max_out_pad * 4)                    # f32 acc temps
    assert vmem_need < vmem_limit, (
        f"MLP too large for whole-weight fused kernel "
        f"({vmem_need} B needed, {vmem_limit} B limit)")
    # TODO(synk): add a K/N-tiled grid path (reduction-last accumulation or
    # pltpu.emit_pipeline over K-tiles per layer) for layers whose weights
    # exceed VMEM residency — most important on v7x (64 MiB per TC).

    flops = sum(2 * b_pad * dip * dop for dip, dop in zip(in_pads, out_pads))
    bytes_accessed = (
        b_pad * din_pad * wt_bytes + b_pad * dout_pad * out_bytes
        + sum(dip * dop * wt_bytes + dop * 4
              for dip, dop in zip(in_pads, out_pads)))

    kernel = functools.partial(_fused_mlp_kernel, num_layers=num_layers)

    out_padded = pl.pallas_call(
        kernel,
        out_shape=jax.ShapeDtypeStruct((b_pad, dout_pad), out_dtype),
        grid=grid,
        in_specs=in_specs,
        out_specs=out_specs,
        scratch_shapes=[pltpu.VMEM((tm, h_scratch_w), compute_dtype)],
        compiler_params=pltpu.CompilerParams(
            dimension_semantics=("parallel",),
            vmem_limit_bytes=vmem_limit,
        ),
        cost_estimate=pl.CostEstimate(
            flops=flops, transcendentals=0, bytes_accessed=bytes_accessed),
    )(x_p, *prepped["flat_wb"])

    return out_padded[:B, :out_dim]


# ------------------------- Parameter construction ----------------------------
def orthogonal_init(key, out_dim, in_dim, dtype=jnp.float32):
    """Semi-orthogonal init, equivalent in spirit to torch.nn.init.orthogonal_
    on a weight of shape [out_dim, in_dim]."""
    rows, cols = out_dim, in_dim
    transpose = rows < cols
    shape = (cols, rows) if transpose else (rows, cols)
    a = jax.random.normal(key, shape, dtype=jnp.float32)
    q, r = jnp.linalg.qr(a)
    d = jnp.sign(jnp.diag(r))
    d = jnp.where(d == 0, 1.0, d)      # avoid zeroing a column on exact-zero diag
    q = q * d[None, :]
    if transpose:
        q = q.T
    return q.astype(dtype)


def make_mlp_params(key, input_dim, hidden_dim, output_dim, hidden_depth):
    """List of (W[in,out], b[out]) matching the PyTorch mlp() stack:
    orthogonal weights, zero biases (weight_init)."""
    if hidden_depth == 0:
        dims = [(input_dim, output_dim)]
    else:
        dims = [(input_dim, hidden_dim)]
        for _ in range(hidden_depth - 1):
            dims.append((hidden_dim, hidden_dim))
        dims.append((hidden_dim, output_dim))
    keys = jax.random.split(key, len(dims))
    params = []
    for k, (din, dout) in zip(keys, dims):
        w_pt = orthogonal_init(k, dout, din)           # PyTorch layout [out, in]
        params.append((w_pt.T, jnp.zeros((dout,), jnp.float32)))
    return params
    # TODO(synk): output_mod (optional extra module) not supported; default is None.


# ------------------------------ References ------------------------------------
def mlp_forward_ref_f32(params, x):
    h = x
    for i, (w, b) in enumerate(params):
        h = h @ w + b.reshape(1, -1)
        if i != len(params) - 1:
            h = jnp.maximum(h, 0.0)
    return h


def mlp_forward_ref_bf16(params, x, compute_dtype=jnp.bfloat16):
    """Pure-JAX reference mimicking the kernel's bf16-operand / f32-accum math."""
    h = x
    for i, (w, b) in enumerate(params):
        h = jnp.dot(h.astype(compute_dtype), w.astype(compute_dtype),
                    preferred_element_type=jnp.float32) + b.reshape(1, -1)
        if i != len(params) - 1:
            h = jnp.maximum(h, 0.0)
    return h


# ---------------------------------- main --------------------------------------
if __name__ == "__main__":
    key = jax.random.PRNGKey(0)
    k_x, k_p = jax.random.split(key)

    batch = 2
    input_dim = 16
    hidden_dim = 32
    output_dim = 8
    hidden_depth = 2

    x = jax.random.normal(k_x, (batch, input_dim), dtype=jnp.float32)
    params = make_mlp_params(k_p, input_dim, hidden_dim, output_dim, hidden_depth)

    # One-time weight padding / bf16 cast (hoisted out of the forward pass).
    prepped = prepare_mlp_params(params)

    out = mlp_forward_fused(prepped, x)
    out = jax.block_until_ready(out)

    assert out.shape == (batch, output_dim), out.shape
    ref_bf16 = mlp_forward_ref_bf16(params, x)
    ref_f32 = mlp_forward_ref_f32(params, x)
    assert jnp.allclose(out, ref_bf16, atol=2e-3, rtol=2e-3), "mismatch vs bf16 reference"
    assert jnp.allclose(out, ref_f32, atol=5e-2, rtol=5e-2), "mismatch vs f32 reference"

    print("KERNEL_OK")
</pallas_src>

<mosaic_0001>
module attributes {stable_mosaic.version = 11 : i64} {
  func.func @_fused_mlp_kernel(%arg0: i32, %arg1: memref<8x128xbf16, #tpu.memory_space<vmem>>, %arg2: memref<128x128xbf16, #tpu.memory_space<vmem>>, %arg3: memref<1x128xf32, #tpu.memory_space<vmem>>, %arg4: memref<128x128xbf16, #tpu.memory_space<vmem>>, %arg5: memref<1x128xf32, #tpu.memory_space<vmem>>, %arg6: memref<128x128xbf16, #tpu.memory_space<vmem>>, %arg7: memref<1x128xf32, #tpu.memory_space<vmem>>, %arg8: memref<8x128xf32, #tpu.memory_space<vmem>>, %arg9: memref<8x128xbf16, #tpu.memory_space<vmem>>) attributes {dimension_semantics = [#tpu.dimension_semantics<parallel>], iteration_bounds = array<i64: 1>, scalar_prefetch = 0 : i64, scratch_operands = 1 : i64, tpu.core_type = #tpu.core_type<tc>, window_params = [{transform_indices = @transform_0, window_bounds = array<i64: 8, 128>}, {pipeline_mode = #tpu.pipeline_mode<synchronous>, transform_indices = @transform_1, window_bounds = array<i64: 128, 128>}, {pipeline_mode = #tpu.pipeline_mode<synchronous>, transform_indices = @transform_2, window_bounds = array<i64: 1, 128>}, {pipeline_mode = #tpu.pipeline_mode<synchronous>, transform_indices = @transform_3, window_bounds = array<i64: 128, 128>}, {pipeline_mode = #tpu.pipeline_mode<synchronous>, transform_indices = @transform_4, window_bounds = array<i64: 1, 128>}, {pipeline_mode = #tpu.pipeline_mode<synchronous>, transform_indices = @transform_5, window_bounds = array<i64: 128, 128>}, {pipeline_mode = #tpu.pipeline_mode<synchronous>, transform_indices = @transform_6, window_bounds = array<i64: 1, 128>}, {transform_indices = @transform_7, window_bounds = array<i64: 8, 128>}]} {
    %c0 = arith.constant 0 : index
    %c0_0 = arith.constant 0 : index
    %0 = vector.load %arg1[%c0, %c0_0] : memref<8x128xbf16, #tpu.memory_space<vmem>>, vector<8x128xbf16>
    %c0_1 = arith.constant 0 : index
    %c0_2 = arith.constant 0 : index
    %1 = vector.load %arg2[%c0_1, %c0_2] : memref<128x128xbf16, #tpu.memory_space<vmem>>, vector<128x128xbf16>
    %cst = arith.constant dense<0.000000e+00> : vector<8x128xf32>
    %2 = tpu.matmul %0, %1, %cst {dimension_numbers = #tpu.dot_dimension_numbers<[1], [0], [0], [1], [0, 0, 1, 1], [], []>} : vector<8x128xbf16>, vector<128x128xbf16>, vector<8x128xf32> -> vector<8x128xf32>
    %c0_3 = arith.constant 0 : index
    %c0_4 = arith.constant 0 : index
    %3 = vector.load %arg3[%c0_3, %c0_4] : memref<1x128xf32, #tpu.memory_space<vmem>>, vector<1x128xf32>
    %4 = vector.broadcast %3 : vector<1x128xf32> to vector<8x128xf32>
    %5 = arith.addf %2, %4 : vector<8x128xf32>
    %cst_5 = arith.constant 0.000000e+00 : f32
    %6 = vector.broadcast %cst_5 : f32 to vector<8x128xf32>
    %7 = arith.maximumf %5, %6 : vector<8x128xf32>
    %8 = arith.truncf %7 : vector<8x128xf32> to vector<8x128xbf16>
    %c0_6 = arith.constant 0 : index
    %c0_7 = arith.constant 0 : index
    %9 = vector.load %arg9[%c0_6, %c0_7] : memref<8x128xbf16, #tpu.memory_space<vmem>>, vector<8x128xbf16>
    tpu.vector_store %arg9[%c0_6, %c0_7], %8 {strides = array<i32>} : memref<8x128xbf16, #tpu.memory_space<vmem>>, vector<8x128xbf16>,
    %c0_8 = arith.constant 0 : index
    %c0_9 = arith.constant 0 : index
    %10 = vector.load %arg9[%c0_8, %c0_9] : memref<8x128xbf16, #tpu.memory_space<vmem>>, vector<8x128xbf16>
    %c0_10 = arith.constant 0 : index
    %c0_11 = arith.constant 0 : index
    %11 = vector.load %arg4[%c0_10, %c0_11] : memref<128x128xbf16, #tpu.memory_space<vmem>>, vector<128x128xbf16>
    %cst_12 = arith.constant dense<0.000000e+00> : vector<8x128xf32>
    %12 = tpu.matmul %10, %11, %cst_12 {dimension_numbers = #tpu.dot_dimension_numbers<[1], [0], [0], [1], [0, 0, 1, 1], [], []>} : vector<8x128xbf16>, vector<128x128xbf16>, vector<8x128xf32> -> vector<8x128xf32>
    %c0_13 = arith.constant 0 : index
    %c0_14 = arith.constant 0 : index
    %13 = vector.load %arg5[%c0_13, %c0_14] : memref<1x128xf32, #tpu.memory_space<vmem>>, vector<1x128xf32>
    %14 = vector.broadcast %13 : vector<1x128xf32> to vector<8x128xf32>
    %15 = arith.addf %12, %14 : vector<8x128xf32>
    %cst_15 = arith.constant 0.000000e+00 : f32
    %16 = vector.broadcast %cst_15 : f32 to vector<8x128xf32>
    %17 = arith.maximumf %15, %16 : vector<8x128xf32>
    %18 = arith.truncf %17 : vector<8x128xf32> to vector<8x128xbf16>
    %c0_16 = arith.constant 0 : index
    %c0_17 = arith.constant 0 : index
    %19 = vector.load %arg9[%c0_16, %c0_17] : memref<8x128xbf16, #tpu.memory_space<vmem>>, vector<8x128xbf16>
    tpu.vector_store %arg9[%c0_16, %c0_17], %18 {strides = array<i32>} : memref<8x128xbf16, #tpu.memory_space<vmem>>, vector<8x128xbf16>,
    %c0_18 = arith.constant 0 : index
    %c0_19 = arith.constant 0 : index
    %20 = vector.load %arg9[%c0_18, %c0_19] : memref<8x128xbf16, #tpu.memory_space<vmem>>, vector<8x128xbf16>
    %c0_20 = arith.constant 0 : index
    %c0_21 = arith.constant 0 : index
    %21 = vector.load %arg6[%c0_20, %c0_21] : memref<128x128xbf16, #tpu.memory_space<vmem>>, vector<128x128xbf16>
    %cst_22 = arith.constant dense<0.000000e+00> : vector<8x128xf32>
    %22 = tpu.matmul %20, %21, %cst_22 {dimension_numbers = #tpu.dot_dimension_numbers<[1], [0], [0], [1], [0, 0, 1, 1], [], []>} : vector<8x128xbf16>, vector<128x128xbf16>, vector<8x128xf32> -> vector<8x128xf32>
    %c0_23 = arith.constant 0 : index
    %c0_24 = arith.constant 0 : index
    %23 = vector.load %arg7[%c0_23, %c0_24] : memref<1x128xf32, #tpu.memory_space<vmem>>, vector<1x128xf32>
    %24 = vector.broadcast %23 : vector<1x128xf32> to vector<8x128xf32>
    %25 = arith.addf %22, %24 : vector<8x128xf32>
    %c0_25 = arith.constant 0 : index
    %c0_26 = arith.constant 0 : index
    %26 = vector.load %arg8[%c0_25, %c0_26] : memref<8x128xf32, #tpu.memory_space<vmem>>, vector<8x128xf32>
    tpu.vector_store %arg8[%c0_25, %c0_26], %25 {strides = array<i32>} : memref<8x128xf32, #tpu.memory_space<vmem>>, vector<8x128xf32>,
    return
  }
  func.func @transform_0(%arg0: i32) -> (i32, i32) {
    %c0_i32 = arith.constant 0 : i32
    %c0_i32_0 = arith.constant 0 : i32
    return %arg0, %c0_i32 : i32, i32
  }
  func.func @transform_1(%arg0: i32) -> (i32, i32) {
    %c0_i32 = arith.constant 0 : i32
    %c0_i32_0 = arith.constant 0 : i32
    %c0_i32_1 = arith.constant 0 : i32
    return %c0_i32, %c0_i32_0 : i32, i32
  }
  func.func @transform_2(%arg0: i32) -> (i32, i32) {
    %c0_i32 = arith.constant 0 : i32
    %c0_i32_0 = arith.constant 0 : i32
    %c0_i32_1 = arith.constant 0 : i32
    return %c0_i32, %c0_i32_0 : i32, i32
  }
  func.func @transform_3(%arg0: i32) -> (i32, i32) {
    %c0_i32 = arith.constant 0 : i32
    %c0_i32_0 = arith.constant 0 : i32
    %c0_i32_1 = arith.constant 0 : i32
    return %c0_i32, %c0_i32_0 : i32, i32
  }
  func.func @transform_4(%arg0: i32) -> (i32, i32) {
    %c0_i32 = arith.constant 0 : i32
    %c0_i32_0 = arith.constant 0 : i32
    %c0_i32_1 = arith.constant 0 : i32
    return %c0_i32, %c0_i32_0 : i32, i32
  }
  func.func @transform_5(%arg0: i32) -> (i32, i32) {
    %c0_i32 = arith.constant 0 : i32
    %c0_i32_0 = arith.constant 0 : i32
    %c0_i32_1 = arith.constant 0 : i32
    return %c0_i32, %c0_i32_0 : i32, i32
  }
  func.func @transform_6(%arg0: i32) -> (i32, i32) {
    %c0_i32 = arith.constant 0 : i32
    %c0_i32_0 = arith.constant 0 : i32
    %c0_i32_1 = arith.constant 0 : i32
    return %c0_i32, %c0_i32_0 : i32, i32
  }
  func.func @transform_7(%arg0: i32) -> (i32, i32) {
    %c0_i32 = arith.constant 0 : i32
    %c0_i32_0 = arith.constant 0 : i32
    return %arg0, %c0_i32 : i32, i32
  }
}

</mosaic_0001>

<bundles_post_ra>
// kernel: tpu_custom_call.1
= control target key start
LH: loop header
LB: loop body
LE: loop exit
PB: predicated region body
PF: predicated region fallthrough
CT: control target
= control target key end

     0   :  { %12 = vsyncpa [#allocation4], 0  ;;  %s999_s0 = inlined_call_operand.hbm [shape: bf16[8,128], index: 0, kind: input, shape index: {}]   ;;  %s1000_s1 = inlined_call_operand.hbm [shape: bf16[128,128], index: 1, kind: input, shape index: {}]   ;;  %s1001_s2 = inlined_call_operand.hbm [shape: f32[1,128], index: 2, kind: input, shape index: {}]   ;;  %s1002_s3 = inlined_call_operand.hbm [shape: bf16[128,128], index: 3, kind: input, shape index: {}]   ;;  %s1003_s4 = inlined_call_operand.hbm [shape: f32[1,128], index: 4, kind: input, shape index: {}]   ;;  %s1004_s5 = inlined_call_operand.hbm [shape: bf16[128,128], index: 5, kind: input, shape index: {}]   ;;  %s1005_s6 = inlined_call_operand.hbm [shape: f32[1,128], index: 6, kind: input, shape index: {}]   ;;  %s1006_s7 = inlined_call_operand.hbm [shape: f32[8,128], index: 7, kind: output, shape index: {}]  }
   0x1   :  { %13 = vsyncpa [#allocation7], 0 }
   0x2   :  { %14 = vsyncpa [#allocation10], 0 }
   0x3   :  { %15 = vsyncpa [#allocation13], 0 }
   0x4   :  { %16 = vsyncpa [#allocation5], 0  ;;  %s812_s24 = smov [#allocation6]   ;;  %s626_s28 = scalar_lea.hbm %s1000_s1, 1024 }
   0x5   :  { %s32_s25 = sshll.u32 %s812_s24, 4  ;;  %p627_p0 = scmp.ne.s32.totalorder %s1000_s1, %s626_s28  ;;  %s33_s25 = int_to_ptr.vmem [resolvable:$true] %s32_s25 }
   0x6   :  { %p630_p1 = scmp.lt.u32.totalorder %s626_s28, %s1000_s1 }
   0x8   :  { %p632_p2 = pnand %p630_p1, %p627_p0 }
   0xa   :  { %635 = shalt.err (!%p632_p2)
}
   0xb   :  { %s636_s10 = scalar_lea.vmem %s33_s25, 1024  ;;  %p641_p4 = scmp.lt.s32.totalorder %s33_s25, %s33_s25 }
   0xc   :  { %p637_p3 = scmp.ne.s32.totalorder %s33_s25, %s636_s10  ;;  %p642_p5 = scmp.lt.s32.totalorder %s636_s10, %s636_s10 }
   0xe   :  { %p643_p6 = por %p642_p5, %p641_p4 }
  0x10   :  { %p644_p7 = pnand %p643_p6, %p637_p3 }
  0x12   :  { %647 = shalt.err (!%p644_p7)
}
  0x13   :  { %s813_s11 = smov 64   ;;  %s814_s12 = smov 4  }
  0x14   :  { %38 = dma.hbm_to_vmem [thread:$0]  %s1000_s1, 1024, %s33_s25, [#allocation7], %s813_s11, %s813_s11, %s814_s12  }
  0x15   :  { %s815_s15 = smov [#allocation9]   ;;  %s816_s17 = smov [#allocation12]  }
  0x16   :  { %s54_s16 = sshll.u32 %s815_s15, 4  ;;  %s76_s18 = sshll.u32 %s816_s17, 4  ;;  %s55_s16 = int_to_ptr.vmem [resolvable:$true] %s54_s16  ;;  %s77_s18 = int_to_ptr.vmem [resolvable:$true] %s76_s18 }
  0x17   :  { %s648_s21 = scalar_lea.hbm %s1002_s3, 1024 }
  0x18   :  { %p649_p8 = scmp.ne.s32.totalorder %s1002_s3, %s648_s21  ;;  %p652_p9 = scmp.lt.u32.totalorder %s648_s21, %s1002_s3 }
  0x1a   :  { %p654_p10 = pnand %p652_p9, %p649_p8 }
  0x1c   :  { %657 = shalt.err (!%p654_p10)
}
  0x1d   :  { %s658_s1 = scalar_lea.vmem %s55_s16, 1024  ;;  %p663_p12 = scmp.lt.s32.totalorder %s55_s16, %s55_s16 }
  0x1e   :  { %p659_p11 = scmp.ne.s32.totalorder %s55_s16, %s658_s1  ;;  %p664_p13 = scmp.lt.s32.totalorder %s658_s1, %s658_s1 }
  0x20   :  { %p665_p0 = por %p664_p13, %p663_p12 }
  0x22   :  { %p666_p1 = pnand %p665_p0, %p659_p11 }
  0x24   :  { %669 = shalt.err (!%p666_p1)
}
  0x25   :  { %60 = dma.hbm_to_vmem [thread:$0]  %s1002_s3, 1024, %s55_s16, [#allocation10], %s813_s11, %s813_s11, %s814_s12  }
  0x26   :  { %s670_s30 = scalar_lea.hbm %s1004_s5, 1024 }
  0x27   :  { %p671_p2 = scmp.ne.s32.totalorder %s1004_s5, %s670_s30  ;;  %p674_p3 = scmp.lt.u32.totalorder %s670_s30, %s1004_s5 }
  0x29   :  { %p676_p4 = pnand %p674_p3, %p671_p2 }
  0x2b   :  { %679 = shalt.err (!%p676_p4)
}
  0x2c   :  { %s680_s14 = scalar_lea.vmem %s77_s18, 1024  ;;  %p685_p6 = scmp.lt.s32.totalorder %s77_s18, %s77_s18 }
  0x2d   :  { %p681_p5 = scmp.ne.s32.totalorder %s77_s18, %s680_s14  ;;  %p686_p7 = scmp.lt.s32.totalorder %s680_s14, %s680_s14 }
  0x2f   :  { %p687_p8 = por %p686_p7, %p685_p6 }
  0x31   :  { %p688_p9 = pnand %p687_p8, %p681_p5 }
  0x33   :  { %691 = shalt.err (!%p688_p9)
}
  0x34   :  { %82 = dma.hbm_to_vmem [thread:$0]  %s1004_s5, 1024, %s77_s18, [#allocation13], %s813_s11, %s813_s11, %s814_s12  }
  0x35   :  { %s817_s16 = smov [#allocation3]   ;;  %s818_s19 = smov [#allocation8]  }
  0x36   :  { %s23_s17 = sshll.u32 %s817_s16, 4  ;;  %s45_s20 = sshll.u32 %s818_s19, 4  ;;  %s24_s17 = int_to_ptr.vmem [resolvable:$true] %s23_s17  ;;  %s46_s20 = int_to_ptr.vmem [resolvable:$true] %s45_s20 }
  0x37   :  { %s692_s23 = scalar_lea.hbm %s999_s0, 64 }
  0x38   :  { %p693_p10 = scmp.ne.s32.totalorder %s999_s0, %s692_s23  ;;  %p696_p11 = scmp.lt.u32.totalorder %s692_s23, %s999_s0 }
  0x3a   :  { %p698_p12 = pnand %p696_p11, %p693_p10 }
  0x3c   :  { %701 = shalt.err (!%p698_p12)
}
  0x3d   :  { %s702_s5 = scalar_lea.vmem %s24_s17, 64  ;;  %p707_p0 = scmp.lt.s32.totalorder %s24_s17, %s24_s17 }
  0x3e   :  { %p703_p13 = scmp.ne.s32.totalorder %s24_s17, %s702_s5  ;;  %p708_p1 = scmp.lt.s32.totalorder %s702_s5, %s702_s5 }
  0x40   :  { %p709_p2 = por %p708_p1, %p707_p0 }
  0x42   :  { %p710_p3 = pnand %p709_p2, %p703_p13 }
  0x44   :  { %713 = shalt.err (!%p710_p3)
}
  0x45   :  { %26 = dma.hbm_to_vmem [thread:$0]  %s999_s0, 64, %s24_s17, [#allocation4]  }
  0x46   :  { %s714_s28 = scalar_lea.hbm %s1001_s2, 16 }
  0x47   :  { %p715_p4 = scmp.ne.s32.totalorder %s1001_s2, %s714_s28  ;;  %p718_p5 = scmp.lt.u32.totalorder %s714_s28, %s1001_s2 }
  0x49   :  { %p720_p6 = pnand %p718_p5, %p715_p4 }
  0x4b   :  { %723 = shalt.err (!%p720_p6)
}
  0x4c   :  { %s724_s10 = scalar_lea.vmem %s46_s20, 16  ;;  %s728_s13 = scalar_lea.vmem %s46_s20, 32 }
  0x4d   :  { %p725_p7 = scmp.ne.s32.totalorder %s46_s20, %s724_s10  ;;  %p729_p8 = scmp.lt.s32.totalorder %s46_s20, %s46_s20 }
  0x4e   :  { %p730_p9 = scmp.lt.s32.totalorder %s728_s13, %s724_s10 }
  0x50   :  { %p731_p10 = por %p730_p9, %p729_p8 }
  0x52   :  { %p732_p11 = pnand %p731_p10, %p725_p7 }
  0x54   :  { %735 = shalt.err (!%p732_p11)
}
  0x55   :  { %48 = dma.hbm_to_vmem [thread:$0]  %s1001_s2, 16, %s46_s20, [#allocation7]  }
  0x56   :  { %s819_s3 = smov [#allocation11]   ;;  %s820_s16 = smov [#allocation14]  }
  0x57   :  { %s67_s15 = sshll.u32 %s819_s3, 4  ;;  %s89_s17 = sshll.u32 %s820_s16, 4  ;;  %s68_s15 = int_to_ptr.vmem [resolvable:$true] %s67_s15  ;;  %s90_s17 = int_to_ptr.vmem [resolvable:$true] %s89_s17 }
  0x58   :  { %s736_s22 = scalar_lea.hbm %s1003_s4, 16 }
  0x59   :  { %p737_p12 = scmp.ne.s32.totalorder %s1003_s4, %s736_s22  ;;  %p740_p13 = scmp.lt.u32.totalorder %s736_s22, %s1003_s4 }
  0x5b   :  { %p742_p0 = pnand %p740_p13, %p737_p12 }
  0x5d   :  { %745 = shalt.err (!%p742_p0)
}
  0x5e   :  { %s746_s2 = scalar_lea.vmem %s68_s15, 16  ;;  %s750_s20 = scalar_lea.vmem %s68_s15, 32 }
  0x5f   :  { %p747_p1 = scmp.ne.s32.totalorder %s68_s15, %s746_s2  ;;  %p751_p2 = scmp.lt.s32.totalorder %s68_s15, %s68_s15 }
  0x60   :  { %p752_p3 = scmp.lt.s32.totalorder %s750_s20, %s746_s2 }
  0x62   :  { %p753_p4 = por %p752_p3, %p751_p2 }
  0x64   :  { %p754_p5 = pnand %p753_p4, %p747_p1 }
  0x66   :  { %757 = shalt.err (!%p754_p5)
}
  0x67   :  { %70 = dma.hbm_to_vmem [thread:$0]  %s1003_s4, 16, %s68_s15, [#allocation10]  }
  0x68   :  { %s758_s18 = scalar_lea.hbm %s1005_s6, 16 }
  0x69   :  { %p759_p6 = scmp.ne.s32.totalorder %s1005_s6, %s758_s18  ;;  %p762_p7 = scmp.lt.u32.totalorder %s758_s18, %s1005_s6 }
  0x6b   :  { %p764_p8 = pnand %p762_p7, %p759_p6 }
  0x6d   :  { %767 = shalt.err (!%p764_p8)
}
  0x6e   :  { %s768_s8 = scalar_lea.vmem %s90_s17, 16  ;;  %s772_s9 = scalar_lea.vmem %s90_s17, 32 }
  0x6f   :  { %p769_p9 = scmp.ne.s32.totalorder %s90_s17, %s768_s8  ;;  %p773_p10 = scmp.lt.s32.totalorder %s90_s17, %s90_s17 }
  0x70   :  { %p774_p11 = scmp.lt.s32.totalorder %s772_s9, %s768_s8 }
  0x72   :  { %p775_p12 = por %p774_p11, %p773_p10 }
  0x74   :  { %p776_p13 = pnand %p775_p12, %p769_p9 }
  0x76   :  { %779 = shalt.err (!%p776_p13)
}
  0x77   :  { %92 = dma.hbm_to_vmem [thread:$0]  %s1005_s6, 16, %s90_s17, [#allocation13]  }
  0x78   :  { %802 = dma.done.wait [#allocation4], 64  }
  0x79   :  { %803 = vsyncadd [#allocation4], 4294967232 }
  0x7a   :  { %804 = dma.done.wait [#allocation7], 1040  }
  0x7b   :  { %805 = vsyncadd [#allocation7], 4294966256 }
  0x7c   :  { %806 = dma.done.wait [#allocation10], 1040  }
  0x7d   :  { %807 = vsyncadd [#allocation10], 4294966256 }
  0x7e   :  { %808 = dma.done.wait [#allocation13], 1040  }
  0x7f   :  { %809 = vsyncadd [#allocation13], 4294966256  ;;  %v821_v0 = vmov 0.0   ;;  %vm822_vm0 = vmmov 0   ;;  %v602_v1 = vld [vmem:[#allocation6] sm:$0xff]   ;;  %v603_v2 = vld [vmem:[#allocation6 + $0x8] sm:$0xff]  }
  0x80   :  { %530 = vmatprep.subr.bf16.mxu0 %v821_v0  ;;  %546 = vmatprep.mubr.msk.bf16.mxu0 %vm822_vm0, %v821_v0  ;;  %v604_v3 = vld [vmem:[#allocation6 + $0x10] sm:$0xff]   ;;  %v610_v4 = vld [vmem:[#allocation9] sm:$0xff]   ;;  %v605_v5 = vld [vmem:[#allocation6 + $0x18] sm:$0xff]   ;;  %s823_s6 = smov [#allocation15]  }
  0x81   :  { %550 = vmatprep.subr.bf16.mxu1 %v821_v0  ;;  %566 = vmatprep.mubr.msk.bf16.mxu1 %vm822_vm0, %v821_v0  ;;  %v611_v6 = vld [vmem:[#allocation9 + $0x8] sm:$0xff]   ;;  %v606_v7 = vld [vmem:[#allocation6 + $0x20] sm:$0xff]   ;;  %v612_v8 = vld [vmem:[#allocation9 + $0x10] sm:$0xff]   ;;  %s464_s13 = sshll.u32 %s823_s6, 4  ;;  %s465_s13 = int_to_ptr.vmem [resolvable:$true] %s464_s13 }
  0x82   :  { %531 = vmatpush3.bf16.msra.mxu0 %v602_v1  ;;  %551 = vmatpush3.bf16.msra.mxu1 %v610_v4  ;;  %v607_v9 = vld [vmem:[#allocation6 + $0x28] sm:$0xff]   ;;  %v613_v10 = vld [vmem:[#allocation9 + $0x18] sm:$0xff]   ;;  %v608_v11 = vld [vmem:[#allocation6 + $0x30] sm:$0xff]   ;;  %s780_s0 = scalar_lea.vmem %s465_s13, 128  ;;  %p785_p1 = scmp.lt.s32.totalorder %s465_s13, %s465_s13 }
  0x83   :  { %532 = vmatprep.subr.bf16.mxu0 %v821_v0  ;;  %552 = vmatprep.subr.bf16.mxu1 %v821_v0  ;;  %v609_v12 = vld [vmem:[#allocation6 + $0x38] sm:$0xff]   ;;  %v614_v14 = vld [vmem:[#allocation9 + $0x20] sm:$0xff]   ;;  %v615_v15 = vld [vmem:[#allocation9 + $0x28] sm:$0xff]   ;;  %p781_p0 = scmp.ne.s32.totalorder %s465_s13, %s780_s0  ;;  %p786_p2 = scmp.lt.s32.totalorder %s780_s0, %s780_s0 }
  0x84   :  { %v115_v13 = vld [vmem:[#allocation3] sm:$0xf]  ;;  %v616_v16 = vld [vmem:[#allocation9 + $0x30] sm:$0xff]   ;;  %v618_v18 = vld [vmem:[#allocation12] sm:$0xff]  }
  0x85   :  { %v617_v17 = vld [vmem:[#allocation9 + $0x38] sm:$0xff]   ;;  %v619_v19 = vld [vmem:[#allocation12 + $0x8] sm:$0xff]   ;;  %v622_v31 = vld [vmem:[#allocation12 + $0x20] sm:$0xff]   ;;  %p787_p3 = por %p786_p2, %p785_p1 }
  0x86   :  { %533 = vmatpush3.bf16.msra.mxu0 %v603_v2  ;;  %553 = vmatpush3.bf16.msra.mxu1 %v611_v6  ;;  %v620_v20 = vld [vmem:[#allocation12 + $0x10] sm:$0xff]   ;;  %v621_v21 = vld [vmem:[#allocation12 + $0x18] sm:$0xff]   ;;  %v623_v32 = vld [vmem:[#allocation12 + $0x28] sm:$0xff]  }
  0x87   :  { %534 = vmatprep.subr.bf16.mxu0 %v821_v0  ;;  %554 = vmatprep.subr.bf16.mxu1 %v821_v0  ;;  %v476_v22 = vld [vmem:[#allocation8] ss:$0 sm:$0xff]  ;;  %v624_v33 = vld [vmem:[#allocation12 + $0x30] sm:$0xff]   ;;  %v485_v35 = vld [vmem:[#allocation11] ss:$0 sm:$0xff]  ;;  %p788_p4 = pnand %p787_p3, %p781_p0 }
  0x88   :  { %v625_v34 = vld [vmem:[#allocation12 + $0x38] sm:$0xff]   ;;  %v494_v44 = vld [vmem:[#allocation14] ss:$0 sm:$0xff] }
  0x8a   :  { %535 = vmatpush3.bf16.msra.mxu0 %v604_v3  ;;  %555 = vmatpush3.bf16.msra.mxu1 %v612_v8 }
  0x8b   :  { %536 = vmatprep.subr.bf16.mxu0 %v821_v0  ;;  %556 = vmatprep.subr.bf16.mxu1 %v821_v0 }
  0x8e   :  { %537 = vmatpush3.bf16.msra.mxu0 %v605_v5  ;;  %557 = vmatpush3.bf16.msra.mxu1 %v613_v10 }
  0x8f   :  { %538 = vmatprep.subr.bf16.mxu0 %v821_v0  ;;  %558 = vmatprep.subr.bf16.mxu1 %v821_v0 }
  0x92   :  { %539 = vmatpush3.bf16.msra.mxu0 %v606_v7  ;;  %559 = vmatpush3.bf16.msra.mxu1 %v614_v14 }
  0x93   :  { %540 = vmatprep.subr.bf16.mxu0 %v821_v0  ;;  %560 = vmatprep.subr.bf16.mxu1 %v821_v0 }
  0x96   :  { %541 = vmatpush3.bf16.msra.mxu0 %v607_v9  ;;  %561 = vmatpush3.bf16.msra.mxu1 %v615_v15 }
  0x97   :  { %542 = vmatprep.subr.bf16.mxu0 %v821_v0  ;;  %562 = vmatprep.subr.bf16.mxu1 %v821_v0 }
  0x9a   :  { %543 = vmatpush3.bf16.msra.mxu0 %v608_v11  ;;  %563 = vmatpush3.bf16.msra.mxu1 %v616_v16 }
  0x9b   :  { %544 = vmatprep.subr.bf16.mxu0 %v821_v0  ;;  %564 = vmatprep.subr.bf16.mxu1 %v821_v0 }
  0x9e   :  { %545 = vmatpush3.bf16.msra.mxu0 %v609_v12  ;;  %565 = vmatpush3.bf16.msra.mxu1 %v617_v17 }
  0x9f   :  { %570 = vmatprep.subr.bf16.mxu0 %v821_v0 }
  0xa1   :  { %547 = vmatmul.mubr.bf16.vlgmr.msra.gmra.mrb[0].mxu0 %v115_v13 }
  0xa2   :  { %586 = vmatprep.mubr.msk.bf16.mxu0 %vm822_vm0, %v821_v0  ;;  %571 = vmatpush3.bf16.msra.mxu0 %v618_v18 }
  0xa3   :  { %572 = vmatprep.subr.bf16.mxu0 %v821_v0 }
  0xa6   :  { %573 = vmatpush3.bf16.msra.mxu0 %v619_v19 }
  0xa7   :  { %574 = vmatprep.subr.bf16.mxu0 %v821_v0 }
  0xaa   :  { %575 = vmatpush3.bf16.msra.mxu0 %v620_v20 }
  0xab   :  { %576 = vmatprep.subr.bf16.mxu0 %v821_v0 }
  0xae   :  { %577 = vmatpush3.bf16.msra.mxu0 %v621_v21 }
  0xaf   :  { %578 = vmatprep.subr.bf16.mxu0 %v821_v0 }
  0xb2   :  { %579 = vmatpush3.bf16.msra.mxu0 %v622_v31 }
  0xb3   :  { %580 = vmatprep.subr.bf16.mxu0 %v821_v0 }
  0xb6   :  { %581 = vmatpush3.bf16.msra.mxu0 %v623_v32 }
  0xb7   :  { %582 = vmatprep.subr.bf16.mxu0 %v821_v0 }
  0xba   :  { %583 = vmatpush3.bf16.msra.mxu0 %v624_v33 }
  0xbb   :  { %584 = vmatprep.subr.bf16.mxu0 %v821_v0 }
  0xbe   :  { %585 = vmatpush3.bf16.msra.mxu0 %v625_v34 }
 0x174   :  { %v221_v23 = vpop.f32.mrb[0].mxu0 }
 0x175   :  { %v222_v24 = vadd.f32 %v476_v22, %v221_v23  ;;  %v548_v25 = vpop.f32.mrb[1].mxu0 }
 0x176   :  { %v224_v26 = vpop.f32.mrb[2].mxu0 }
 0x177   :  { %v227_v27 = vmax.f32 %v222_v24, 0.0  ;;  %v549_v28 = vpop.f32.mrb[3].mxu0 }
 0x179   :  { %v228_v29 = vpack.c.bf16 %v227_v27, %v227_v27 }
 0x17b   :  { %229 = vst [vmem:[#allocation2] sm:$0xf] %v228_v29 }
 0x182   :  { %v230_v30 = vld [vmem:[#allocation2] sm:$0xf] }
 0x183   :  { %567 = vmatmul.mubr.bf16.vlgmr.msra.gmra.mrb[0].mxu1 %v230_v30 }
 0x256   :  { %v336_v36 = vpop.f32.mrb[0].mxu1 }
 0x257   :  { %v337_v37 = vadd.f32 %v485_v35, %v336_v36  ;;  %v568_v38 = vpop.f32.mrb[1].mxu1 }
 0x258   :  { %v339_v39 = vpop.f32.mrb[2].mxu1 }
 0x259   :  { %v342_v40 = vmax.f32 %v337_v37, 0.0  ;;  %v569_v41 = vpop.f32.mrb[3].mxu1 }
 0x25b   :  { %v343_v42 = vpack.c.bf16 %v342_v40, %v342_v40 }
 0x25d   :  { %344 = vst [vmem:[#allocation2] sm:$0xf] %v343_v42 }
 0x264   :  { %v345_v43 = vld [vmem:[#allocation2] sm:$0xf] }
 0x265   :  { %587 = vmatmul.mubr.bf16.vlgmr.msra.gmra.mrb[4].mxu0 %v345_v43 }
 0x338   :  { %v451_v45 = vpop.f32.mrb[4].mxu0 }
 0x339   :  { %v452_v46 = vadd.f32 %v494_v44, %v451_v45  ;;  %v588_v47 = vpop.f32.mrb[5].mxu0 }
 0x33a   :  { %v454_v48 = vpop.f32.mrb[6].mxu0 }
 0x33b   :  { %457 = vst [vmem:[#allocation15] sm:$0xff] %v452_v46  ;;  %v589_v49 = vpop.f32.mrb[7].mxu0 }
 0x33c   :  { %791 = shalt.err (!%p788_p4)
}
 0x33d   :  { %s792_s15 = scalar_lea.hbm %s1006_s7, 128 }
 0x33e   :  { %p793_p5 = scmp.ne.s32.totalorder %s1006_s7, %s792_s15  ;;  %p796_p6 = scmp.lt.u32.totalorder %s792_s15, %s1006_s7 }
 0x340   :  { %p798_p7 = pnand %p796_p6, %p793_p5 }
 0x342   :  { %801 = shalt.err (!%p798_p7)
}
 0x343   :  { %467 = dma.vmem_to_hbm [thread:$0]  %s465_s13, 128, %s1006_s7, [#allocation5]  }
 0x344   :  { %810 = dma.done.wait [#allocation5], 128  }
 0x345   :  { %811 = vsyncadd [#allocation5], 4294967168 }
 0x346   :  { %471 = vsyncpa [#allocation4], 1 }
 0x347   :  { %472 = vsyncpa [#allocation7], 1 }
 0x348   :  { %473 = vsyncpa [#allocation10], 1 }
 0x349   :  { %474 = vsyncpa [#allocation13], 1 }
 0x34a   :  { %475 = vsyncpa [#allocation5], 1 }

</bundles_post_ra>
